<compile_context>
chip_gen: v7x
topology: tpu7x:2x2x1
jax: 0.10.0
libtpu: 0.0.40
codegen_flags: <defaults>
</compile_context>

<pallas_src>
import math

import numpy as np

import jax
import jax.numpy as jnp
from jax.experimental import pallas as pl
from jax.experimental.pallas import tpu as pltpu


# ----------------------------------------------------------------------------------
# Pallas kernels
# ----------------------------------------------------------------------------------

def _matmul_bias_kernel(x_ref, w_ref, b_ref, o_ref):
    o_ref[...] = (jnp.dot(x_ref[...], w_ref[...],
                          preferred_element_type=jnp.float32) + b_ref[...])


def matmul_bias(x, w, b, *, row_tile=1024):
    """(rows, K) @ (K, N) + b — tiled over rows, output padded to 128 lanes (lane-dense
    stores), sliced back to N in the wrapper.  Used for the SOL 1x1-conv head."""
    rows, k = x.shape
    n = w.shape[1]
    n_pad = ((n + 127) // 128) * 128
    w_p = jnp.zeros((k, n_pad), jnp.float32).at[:, :n].set(w.astype(jnp.float32))
    b_p = jnp.zeros((1, n_pad), jnp.float32).at[0, :n].set(
        b.reshape(-1).astype(jnp.float32))

    if rows <= row_tile or rows < 8:
        rt = rows
    else:
        rt = (row_tile // 8) * 8
    rows_p = ((rows + rt - 1) // rt) * rt
    x_p = x.astype(jnp.float32)
    if rows_p != rows:
        x_p = jnp.pad(x_p, ((0, rows_p - rows), (0, 0)))

    out = pl.pallas_call(
        _matmul_bias_kernel,
        out_shape=jax.ShapeDtypeStruct((rows_p, n_pad), jnp.float32),
        grid=(rows_p // rt,),
        in_specs=[pl.BlockSpec((rt, k), lambda i: (i, 0)),
                  pl.BlockSpec((k, n_pad), lambda i: (0, 0)),
                  pl.BlockSpec((1, n_pad), lambda i: (0, 0))],
        out_specs=pl.BlockSpec((rt, n_pad), lambda i: (i, 0)),
        compiler_params=pltpu.CompilerParams(
            dimension_semantics=("parallel",),
            vmem_limit_bytes=32 * 1024 * 1024),
    )(x_p, w_p, b_p)
    return out[:rows, :n]


def _line_fused_kernel(corners_ref, cw_ref, pool_ref, w_ref, b_ref, mask_ref,
                       logp_ref, norm_ref):
    """Fused per-line pipeline (all lane-dense, pixels on the lane axis):
         4-corner bilinear combine of pre-gathered corner values (VPU)
           -> (l + 1) * 128 normalized line image   (aux output, (C, Npix))
           -> mean over line height via static 1/Hg pooling weights (per-channel lane reduce)
           -> per-timestep linear + log-softmax HW head (128-lane-dense output).

    corners_ref : (1, 4, C, Npix)   gathered corner pixel values
    cw_ref      : (1, 4, 1, Npix)   bilinear weights (zeros-padding validity folded in)
    pool_ref    : (T, Npix)         static Hg-mean pooling weights (pixel order p = t*Hg + h)
    w_ref       : (C, Npad), b_ref : (1, Npad), mask_ref : (1, Npad)  padded HW head
    logp_ref    : (1, T, Npad)      per-timestep log-softmax
    norm_ref    : (1, C, Npix)      (sample + 1) * 128
    """
    cors = corners_ref[0]                      # (4, C, Npix)
    cwts = cw_ref[0]                           # (4, 1, Npix)

    # Bilinear combine of the 4 pre-gathered corners (weights broadcast over C sublanes).
    sample = (cwts[0] * cors[0] + cwts[1] * cors[1] +
              cwts[2] * cors[2] + cwts[3] * cors[3])          # (C, Npix)

    # (l + 1) * 128 normalized line image (the reference's line_imgs entries), lane-dense.
    norm_ref[0] = (sample + 1.0) * 128.0

    # Hg-mean pooling + HW linear head.  C is tiny (3), so instead of MXU matmuls with
    # 3/256 useful lanes (and a (C, Npix) transpose) we do a per-channel lane reduction
    # (VPU/XLU) and a rank-1 broadcast update of the 128-lane-wide logits.
    pool = pool_ref[...]                                      # (T, Npix)
    logits = b_ref[...] + mask_ref[...]                       # (1, Npad) -> (T, Npad)
    nchan = sample.shape[0]
    for ci in range(nchan):
        feat_c = jnp.sum(pool * sample[ci:ci + 1, :], axis=1, keepdims=True)   # (T, 1)
        logits = logits + feat_c * w_ref[ci:ci + 1, :]                          # (T, Npad)

    # Log-softmax over the lane-dense character axis; padded lanes carry -1e30 -> exp == 0.
    m = jnp.max(logits, axis=-1, keepdims=True)
    e = jnp.exp(logits - m)
    logp_ref[0] = logits - m - jnp.log(jnp.sum(e, axis=-1, keepdims=True))


def sample_lines_and_decode(img, grid_line, w_hw, b_hw):
    """grid_sample + (l+1)*128 line-norm + mean-over-height + HW head over all lines.

    img       : (1, C, H, W)   the full page image
    grid_line : (K, Hg, T, 2)  per-line sampling grids (PyTorch grid_sample layout)
    Mirrors the reference:
      line = grid_sample(img.transpose(2,3), grid_line); line = line.transpose(2,3)
      line_imgs entry = (line HWC + 1) * 128
      hw = log_softmax(Linear(mean over line height))
    Returns (logp (K, T, n_chars), normed (K, C, T*Hg)).
    """
    _, c, h, w = img.shape
    n_chars = w_hw.shape[1]
    # reference transposes image dims (2, 3) before grid_sample
    hin, win = w, h
    img_flat = jnp.transpose(img[0], (2, 1, 0)).reshape(hin * win, c).astype(jnp.float32)

    k, hg, t, _ = grid_line.shape
    npix = hg * t
    # pixel order p = t_idx*Hg + h_idx so (C, Npix) reshapes straight to (C, T, Hg)
    g = jnp.transpose(grid_line, (0, 2, 1, 3)).reshape(k, npix, 2).astype(jnp.float32)
    gx, gy = g[..., 0], g[..., 1]

    # Old-PyTorch grid_sample semantics (align_corners=True), padding_mode='zeros'.
    x = (gx + 1.0) * 0.5 * (win - 1)
    y = (gy + 1.0) * 0.5 * (hin - 1)
    x0 = jnp.floor(x)
    y0 = jnp.floor(y)
    x1 = x0 + 1.0
    y1 = y0 + 1.0
    wx1 = x - x0
    wx0 = 1.0 - wx1
    wy1 = y - y0
    wy0 = 1.0 - wy1

    # TODO(synk): the per-pixel dynamic gather from the page image has no cheap BlockSpec
    # expression; it is done with one XLA gather here (a fully-in-Pallas variant would need
    # a manual DMA gather from an HBM-resident image).
    def corner(xc, yc, wgt):
        valid = ((xc >= 0.0) & (xc <= win - 1.0) &
                 (yc >= 0.0) & (yc <= hin - 1.0)).astype(jnp.float32)
        xi = jnp.clip(xc, 0.0, win - 1.0).astype(jnp.int32)
        yi = jnp.clip(yc, 0.0, hin - 1.0).astype(jnp.int32)
        flat = yi * win + xi                                            # (K, Npix)
        vals = jnp.take(img_flat, flat.reshape(-1), axis=0).reshape(k, npix, c)
        return jnp.transpose(vals, (0, 2, 1)), wgt * valid              # (K, C, Npix), (K, Npix)

    c00, w00 = corner(x0, y0, wx0 * wy0)
    c10, w10 = corner(x1, y0, wx1 * wy0)
    c01, w01 = corner(x0, y1, wx0 * wy1)
    c11, w11 = corner(x1, y1, wx1 * wy1)
    corners = jnp.stack([c00, c10, c01, c11], axis=1)                   # (K, 4, C, Npix)
    cweights = jnp.stack([w00, w10, w01, w11], axis=1)[:, :, None]      # (K, 4, 1, Npix)

    # Bucket K to a multiple of 8: even megacore split + recompile avoidance across calls.
    kp = max(8, ((k + 7) // 8) * 8)
    if kp != k:
        corners = jnp.pad(corners, ((0, kp - k), (0, 0), (0, 0), (0, 0)))
        cweights = jnp.pad(cweights, ((0, kp - k), (0, 0), (0, 0), (0, 0)))

    # Static Hg-mean pooling weights (no in-kernel iota builds).
    pool = jnp.asarray(
        np.kron(np.eye(t, dtype=np.float32),
                np.full((1, hg), 1.0 / hg, dtype=np.float32)))          # (T, Npix)

    npad = max(128, ((n_chars + 127) // 128) * 128)
    w_p = jnp.zeros((c, npad), jnp.float32).at[:, :n_chars].set(w_hw.astype(jnp.float32))
    b_p = jnp.zeros((1, npad), jnp.float32).at[0, :n_chars].set(
        b_hw.reshape(-1).astype(jnp.float32))
    col_mask = jnp.full((1, npad), -1e30, jnp.float32).at[0, :n_chars].set(0.0)

    logp, normed = pl.pallas_call(
        _line_fused_kernel,
        out_shape=(jax.ShapeDtypeStruct((kp, t, npad), jnp.float32),
                   jax.ShapeDtypeStruct((kp, c, npix), jnp.float32)),
        grid=(kp,),
        in_specs=[
            pl.BlockSpec((1, 4, c, npix), lambda i: (i, 0, 0, 0)),
            pl.BlockSpec((1, 4, 1, npix), lambda i: (i, 0, 0, 0)),
            # constant block indices -> DMA'd once, reused every grid step
            pl.BlockSpec((t, npix), lambda i: (0, 0)),
            pl.BlockSpec((c, npad), lambda i: (0, 0)),
            pl.BlockSpec((1, npad), lambda i: (0, 0)),
            pl.BlockSpec((1, npad), lambda i: (0, 0)),
        ],
        out_specs=(
            pl.BlockSpec((1, t, npad), lambda i: (i, 0, 0)),
            pl.BlockSpec((1, c, npix), lambda i: (i, 0, 0)),
        ),
        compiler_params=pltpu.CompilerParams(
            dimension_semantics=("parallel",),     # lines shard across the 2 TCs on v7x
            vmem_limit_bytes=32 * 1024 * 1024),
    )(corners, cweights, pool, w_p, b_p, col_mask)
    return logp[:k, :, :n_chars], normed[:k]


_sample_lines_and_decode = jax.jit(sample_lines_and_decode)


# ----------------------------------------------------------------------------------
# Synthetic sub-nets (deterministic stand-ins for sol / lf)
# ----------------------------------------------------------------------------------

def sol_forward(img, w_sol, b_sol, anchor_stride=8):
    """Start-of-line detector stand-in: 1x1 conv (tiled Pallas matmul) + anchor decode.

    Anchor pixels are gathered BEFORE the 1x1-conv matmul (a 1x1 conv commutes with the
    stride-8 subsample), so the matmul only touches the kept anchors.
    Returns start predictions (B, Na, 5) = [conf, x, y, r, s] with x, y in [-1, 1].
    """
    b, c, h, w = img.shape
    off = anchor_stride // 2
    anchors_img = img[:, :, off::anchor_stride, off::anchor_stride]     # (B, C, Ny, Nx)
    ny, nx = anchors_img.shape[2], anchors_img.shape[3]
    x2d = jnp.transpose(anchors_img, (0, 2, 3, 1)).reshape(b * ny * nx, c)
    pred = matmul_bias(x2d, w_sol, b_sol).reshape(b, ny * nx, 5)        # (B, Na, 5)

    ys = jnp.arange(off, h, anchor_stride)
    xs = jnp.arange(off, w, anchor_stride)
    ax = ((xs.astype(jnp.float32) + 0.5) / w) * 2.0 - 1.0
    ay = ((ys.astype(jnp.float32) + 0.5) / h) * 2.0 - 1.0
    gx, gy = jnp.meshgrid(ax, ay)                                       # (Ny, Nx), 'xy'
    base_xy = jnp.stack([gx.reshape(-1), gy.reshape(-1)], axis=-1)[None]  # (1, Na, 2)

    conf = jax.nn.sigmoid(pred[..., 0:1])
    xy = jnp.clip(base_xy + 0.1 * jnp.tanh(pred[..., 1:3]), -1.0, 1.0)
    r = 0.3 * math.pi * jnp.tanh(pred[..., 3:4])
    s = jax.nn.sigmoid(pred[..., 4:5])
    return jnp.concatenate([conf, xy, r, s], axis=-1)                   # (B, Na, 5)


def lf_forward(expand_img, sub_positions_list, steps, negate_lw=False,
               allow_end_early=False, grid_h=8, step_len=0.04,
               line_half_height=0.06):
    """Line-follower stand-in: walks from (x, y) along direction r, scale s.

    Returns (grid_line, None, out_positions, xy_positions) mirroring the original API.
    grid_line: (N, grid_h, steps, 2) normalized sampling grid.
    """
    del expand_img, allow_end_early  # image-conditioned stepping is part of the real LF net
    pos0 = sub_positions_list[0]                               # (N, 5): x, y, r, s, conf
    x0, y0, r, s, conf = (pos0[:, i] for i in range(5))
    sign = -1.0 if negate_lw else 1.0
    dx = sign * step_len * (1.0 + 0.5 * s) * jnp.cos(r)
    dy = sign * step_len * (1.0 + 0.5 * s) * jnp.sin(r)

    out_positions, xy_positions = [], []
    for t in range(steps + 1):
        xt = x0 + t * dx
        yt = y0 + t * dy
        out_positions.append(jnp.stack([xt, yt, r, s, conf], axis=1))
        xy_positions.append(jnp.stack([xt, yt], axis=1))

    t_idx = jnp.arange(steps, dtype=jnp.float32)
    h_off = ((jnp.arange(grid_h, dtype=jnp.float32) - (grid_h - 1) / 2.0)
             / ((grid_h - 1) / 2.0)) * line_half_height
    px, py = -jnp.sin(r), jnp.cos(r)
    cx = x0[:, None] + t_idx[None, :] * dx[:, None]            # (N, steps)
    cy = y0[:, None] + t_idx[None, :] * dy[:, None]
    gx = cx[:, None, :] + h_off[None, :, None] * px[:, None, None]
    gy = cy[:, None, :] + h_off[None, :, None] * py[:, None, None]
    grid_line = jnp.clip(jnp.stack([gx, gy], axis=-1), -1.0, 1.0)  # (N, grid_h, steps, 2)
    return grid_line, None, out_positions, xy_positions


# ----------------------------------------------------------------------------------
# E2E model
# ----------------------------------------------------------------------------------

class E2EModelPallas:
    def __init__(self, params):
        self.params = params
        # TODO(synk): COCODemo / Mask R-CNN detector has no Pallas equivalent; the
        # xyrs start boxes are taken from the SOL stand-in instead.

    def forward(self, x, use_full_img=True, accpet_threshold=0.1):
        p = self.params
        sol_img = x['full_img'].astype(jnp.float32)
        if use_full_img:
            img = sol_img
            results_scale = 1.0
        else:
            img = sol_img
            results_scale = x['resize_scale']

        original_starts = sol_forward(sol_img, p['w_sol'], p['b_sol'])

        # --- start boxes (stand-in for Mask R-CNN xyxy -> xyrs) -----------------
        start = original_starts                                # (B, Na, 5)
        # NOTE: the reference computes a descending sort of confidences and never uses it;
        # that dead compute is dropped here.  Likewise `accpet_threshold` is dead: the
        # reference unconditionally overrides it with 0.47 (kept for parity).
        # Host-side data-dependent selection (mirrors the reference np.where).  This is the
        # single unavoidable host sync: the number of lines K is data-dependent.
        start_np = np.asarray(jax.device_get(start))
        select = start_np[..., 0:1] >= accpet_threshold
        select = start_np[..., 0:1] >= 0.47
        select_idx = np.where(select[..., 0])[1]
        if select_idx.size == 0:
            return None
        start = start[:, select_idx, :]                        # (B, K, 5)
        if start.ndim != 3:
            return None

        forward_img = img
        start = jnp.transpose(start, (1, 0, 2))                # (K, B, 5)
        positions = jnp.concatenate(
            [start[..., 1:3], start[..., 3:4], start[..., 4:5], start[..., 0:1]], axis=2)

        # p_interval == K in the reference, so its outer/inner python loops execute exactly
        # once; all lines are handled by one fused, gridded pallas_call below.
        step_size, extra_bw, forward_steps = 5, 1, 40
        sub_positions = [positions[:, 0, :]]                   # (K, 5)

        grid_line, _, out_positions, xy_positions = lf_forward(
            forward_img, sub_positions, steps=step_size)
        grid_line, _, out_positions, xy_positions = lf_forward(
            forward_img, [out_positions[step_size]],
            steps=step_size + extra_bw, negate_lw=True)
        grid_line, _, out_positions, xy_positions = lf_forward(
            forward_img, [out_positions[step_size + extra_bw]],
            steps=forward_steps, allow_end_early=True)
        lf_xy_positions = xy_positions

        # Fused corner-combine + (l+1)*128 + mean-over-height + HW head: one kernel, one
        # grid over lines, lane-dense buffers; the line tensor never round-trips HBM
        # between stages.
        logp, normed = _sample_lines_and_decode(
            forward_img, grid_line, p['w_hw'], p['b_hw'])
        hw_out = logp                                          # (K, T, n_chars)

        k, hg, t, _ = grid_line.shape
        c = forward_img.shape[1]
        normed_np = np.asarray(jax.device_get(normed))         # single host transfer, (K, C, Npix)
        line_imgs = [np.transpose(normed_np[li].reshape(c, t, hg), (1, 2, 0))
                     for li in range(k)]                       # each (T, Hg, C)

        return {
            'original_sol': original_starts,
            'sol': positions,
            'lf': lf_xy_positions,
            'hw': hw_out,
            'results_scale': results_scale,
            'line_imgs': line_imgs,
        }


def init_params(key, c_in=3, n_chars=10):
    k1, k2, k3, k4 = jax.random.split(key, 4)
    w_sol = 0.1 * jax.random.normal(k1, (c_in, 5), dtype=jnp.float32)
    b_sol = jnp.zeros((5,), dtype=jnp.float32).at[0].set(1.0)   # bias conf so some starts pass 0.47
    w_hw = 0.5 * jax.random.normal(k3, (c_in, n_chars), dtype=jnp.float32)
    b_hw = 0.05 * jax.random.normal(k4, (n_chars,), dtype=jnp.float32)
    return {'w_sol': w_sol, 'b_sol': b_sol, 'w_hw': w_hw, 'b_hw': b_hw}


if __name__ == "__main__":
    key = jax.random.PRNGKey(0)
    k_img, k_par = jax.random.split(key)

    B, C, H, W = 1, 3, 32, 32
    full_img = jax.random.normal(k_img, (B, C, H, W), dtype=jnp.float32)
    x = {'full_img': full_img, 'resize_scale': 1.0, 'np_img': np.asarray(full_img)}

    model = E2EModelPallas(init_params(k_par, c_in=C, n_chars=10))
    out = model.forward(x)
    assert out is not None, "no start-of-line candidates passed the threshold"

    jax.block_until_ready(out['hw'])
    jax.block_until_ready(out['sol'])
    jax.block_until_ready(out['original_sol'])
    assert out['hw'].ndim == 3 and out['hw'].shape[1] == 40
    assert len(out['line_imgs']) == out['hw'].shape[0]
    assert out['line_imgs'][0].shape == (40, 8, C)
    assert bool(jnp.all(jnp.isfinite(out['hw'])))
    print("KERNEL_OK")
</pallas_src>

<mosaic_0001>
module attributes {stable_mosaic.version = 11 : i64} {
  func.func @_matmul_bias_kernel(%arg0: i32, %arg1: memref<16x3xf32, #tpu.memory_space<vmem>>, %arg2: memref<3x128xf32, #tpu.memory_space<vmem>>, %arg3: memref<1x128xf32, #tpu.memory_space<vmem>>, %arg4: memref<16x128xf32, #tpu.memory_space<vmem>>) attributes {dimension_semantics = [#tpu.dimension_semantics<parallel>], iteration_bounds = array<i64: 1>, scalar_prefetch = 0 : i64, scratch_operands = 0 : i64, tpu.core_type = #tpu.core_type<tc>, window_params = [{transform_indices = @transform_0, window_bounds = array<i64: 16, 3>}, {pipeline_mode = #tpu.pipeline_mode<synchronous>, transform_indices = @transform_1, window_bounds = array<i64: 3, 128>}, {pipeline_mode = #tpu.pipeline_mode<synchronous>, transform_indices = @transform_2, window_bounds = array<i64: 1, 128>}, {transform_indices = @transform_3, window_bounds = array<i64: 16, 128>}]} {
    %c0 = arith.constant 0 : index
    %c0_0 = arith.constant 0 : index
    %0 = vector.load %arg1[%c0, %c0_0] : memref<16x3xf32, #tpu.memory_space<vmem>>, vector<16x3xf32>
    %c0_1 = arith.constant 0 : index
    %c0_2 = arith.constant 0 : index
    %1 = vector.load %arg2[%c0_1, %c0_2] : memref<3x128xf32, #tpu.memory_space<vmem>>, vector<3x128xf32>
    %cst = arith.constant dense<0.000000e+00> : vector<16x128xf32>
    %2 = tpu.matmul %0, %1, %cst {dimension_numbers = #tpu.dot_dimension_numbers<[1], [0], [0], [1], [0, 0, 1, 1], [], []>} : vector<16x3xf32>, vector<3x128xf32>, vector<16x128xf32> -> vector<16x128xf32>
    %c0_3 = arith.constant 0 : index
    %c0_4 = arith.constant 0 : index
    %3 = vector.load %arg3[%c0_3, %c0_4] : memref<1x128xf32, #tpu.memory_space<vmem>>, vector<1x128xf32>
    %4 = vector.broadcast %3 : vector<1x128xf32> to vector<16x128xf32>
    %5 = arith.addf %2, %4 : vector<16x128xf32>
    %c0_5 = arith.constant 0 : index
    %c0_6 = arith.constant 0 : index
    %6 = vector.load %arg4[%c0_5, %c0_6] : memref<16x128xf32, #tpu.memory_space<vmem>>, vector<16x128xf32>
    tpu.vector_store %arg4[%c0_5, %c0_6], %5 {strides = array<i32>} : memref<16x128xf32, #tpu.memory_space<vmem>>, vector<16x128xf32>,
    return
  }
  func.func @transform_0(%arg0: i32) -> (i32, i32) {
    %c0_i32 = arith.constant 0 : i32
    %c0_i32_0 = arith.constant 0 : i32
    return %arg0, %c0_i32 : i32, i32
  }
  func.func @transform_1(%arg0: i32) -> (i32, i32) {
    %c0_i32 = arith.constant 0 : i32
    %c0_i32_0 = arith.constant 0 : i32
    %c0_i32_1 = arith.constant 0 : i32
    return %c0_i32, %c0_i32_0 : i32, i32
  }
  func.func @transform_2(%arg0: i32) -> (i32, i32) {
    %c0_i32 = arith.constant 0 : i32
    %c0_i32_0 = arith.constant 0 : i32
    %c0_i32_1 = arith.constant 0 : i32
    return %c0_i32, %c0_i32_0 : i32, i32
  }
  func.func @transform_3(%arg0: i32) -> (i32, i32) {
    %c0_i32 = arith.constant 0 : i32
    %c0_i32_0 = arith.constant 0 : i32
    return %arg0, %c0_i32 : i32, i32
  }
}

</mosaic_0001>

<bundles_post_ra>
// kernel: tpu_custom_call.1
= control target key start
LH: loop header
LB: loop body
LE: loop exit
PB: predicated region body
PF: predicated region fallthrough
CT: control target
= control target key end

     0   :  { %vm32_vm0 = vcmask 1042432   ;;  %vm25_vm1 = vcmask 23552   ;;  %s215_s0 = inlined_call_operand.vmem [shape: f32[16,3], index: 0, kind: input, shape index: {}]   ;;  %s216_s1 = inlined_call_operand.vmem [shape: f32[3,128], index: 1, kind: input, shape index: {}]   ;;  %s217_s2 = inlined_call_operand.vmem [shape: f32[1,128], index: 2, kind: input, shape index: {}]   ;;  %s218_s3 = inlined_call_operand.hbm [shape: f32[16,128], index: 3, kind: output, shape index: {}]  }
   0x1   :  { %v17_v0 = vld [vmem:[%s216_s1] sm:$0x7]  ;;  %v16_v2 = vld [vmem:[%s215_s0 + $0x8] sm:$0xff] }
   0x2   :  { %v15_v1 = vld [vmem:[%s215_s0] sm:$0xff]  ;;  %136 = vmatprep.subr.msk.mxu0 %vm32_vm0, %v17_v0 }
   0x3   :  { %138 = vmatprep.mubr.msk.f32.mxu0 %vm25_vm1, %v15_v1 }
   0x4   :  { %8 = vsyncpa [#allocation3], 0  ;;  %137 = vmatpush3.msk.msra.mxu0 %vm32_vm0, %v17_v0  ;;  %v129_v3 = vld [vmem:[%s217_s2] ss:$0 sm:$0xff]  ;;  %s168_s1 = smov [#allocation2]  }
   0x5   :  { %139 = vmatmul.mubr.msk.f32.vlgmr.msra.gmra.mrb[0].mxu0 %vm25_vm1, %v16_v2  ;;  %s118_s20 = sshll.u32 %s168_s1, 4  ;;  %s119_s20 = int_to_ptr.vmem [resolvable:$true] %s118_s20 }
   0x6   :  { %s144_s21 = scalar_lea.vmem %s119_s20, 256  ;;  %p149_p1 = scmp.lt.s32.totalorder %s119_s20, %s119_s20 }
   0x7   :  { %p145_p0 = scmp.ne.s32.totalorder %s119_s20, %s144_s21  ;;  %p150_p2 = scmp.lt.s32.totalorder %s144_s21, %s144_s21 }
   0x9   :  { %p151_p3 = por %p150_p2, %p149_p1 }
   0xb   :  { %p152_p4 = pnand %p151_p3, %p145_p0 }
  0xd8   :  { %v140_v4 = vpop.f32.mrb[0].mxu0 }
  0xd9   :  { %v108_v5 = vadd.f32 %v140_v4, %v129_v3  ;;  %v102_v6 = vpop.f32.mrb[1].mxu0 }
  0xda   :  { %v103_v7 = vadd.f32 %v129_v3, %v102_v6 }
  0xdb   :  { %112 = vst [vmem:[#allocation2 + $0x8] sm:$0xff] %v108_v5 }
  0xdc   :  { %111 = vst [vmem:[#allocation2] sm:$0xff] %v103_v7 }
  0xdd   :  { %155 = shalt.err (!%p152_p4)
}
  0xde   :  { %s156_s2 = scalar_lea.hbm %s218_s3, 256 }
  0xdf   :  { %p157_p5 = scmp.ne.s32.totalorder %s218_s3, %s156_s2  ;;  %p160_p6 = scmp.lt.u32.totalorder %s156_s2, %s218_s3 }
  0xe1   :  { %p162_p7 = pnand %p160_p6, %p157_p5 }
  0xe3   :  { %165 = shalt.err (!%p162_p7)
}
  0xe4   :  { %s169_s27 = smov 128   ;;  %s170_s28 = smov 8  }
  0xe5   :  { %124 = dma.vmem_to_hbm [thread:$0]  %s119_s20, 256, %s218_s3, [#allocation3], %s169_s27, %s169_s27, %s170_s28  }
  0xe6   :  { %166 = dma.done.wait [#allocation3], 256  }
  0xe7   :  { %167 = vsyncadd [#allocation3], 4294967040 }
  0xe8   :  { %128 = vsyncpa [#allocation3], 1 }

</bundles_post_ra>
